<compile_context>
chip_gen: v5e
topology: v5e:2x2
jax: 0.10.0
libtpu: 0.0.40
codegen_flags: <defaults>
</compile_context>

<pallas_src>
import functools
import math

import jax
import jax.numpy as jnp
from jax.experimental import pallas as pl
from jax.experimental.pallas import tpu as pltpu


# --------------------------- fused TCN kernel -------------------------------

def _tcn_kernel(x_ref, w_ref, o_ref, *, layer_cfgs, kernel_size, seq_len,
                mxu_dtype):
    """Fully fused TCN forward on one flattened batch tile.

    x_ref : (Bblk*L, Cin0)     activation slab, row = b*L + t
    w_ref : (Wrows, Wcols)     packed f32 weight/bias slab (static offsets)
    o_ref : (Bblk*L, Cout_last)
    """
    bl = x_ref.shape[0]
    f32_mxu = jnp.dtype(mxu_dtype) == jnp.dtype(jnp.float32)
    prec = jax.lax.Precision.HIGHEST if f32_mxu else None

    # Within-sequence position of every flattened row.  Hoisted once and reused
    # by every tap of every layer (JAX does not CSE broadcasted_iota).
    pos = jax.lax.broadcasted_iota(jnp.int32, (bl, 1), 0) % seq_len

    def mm(a, w):
        return jax.lax.dot_general(a, w, (((1,), (0,)), ((), ())),
                                   preferred_element_type=jnp.float32,
                                   precision=prec)

    def shifted(hm, s):
        # y[b*L + t] = h[b*L + t - s] if t >= s else 0  (causal shift by s
        # inside each length-L sequence of the flattened slab).  The roll is a
        # static sublane slice+concat; rows that would leak across a batch
        # boundary (t < s) are masked to zero.
        if s == 0:
            return hm
        rolled = jnp.roll(hm, s, axis=0)
        return jnp.where(pos >= s, rolled, jnp.zeros_like(rolled))

    def causal_conv(hm, w, b, dilation):
        # Dilated causal conv == conv1d(padding=pad) + Chomp1d(pad):
        #   out[t] = b + sum_j h[t - dilation*(K-1-j)] @ w[j]
        # All K taps folded into a single matmul over a (bl, K*Cin) slab.
        taps = [shifted(hm, dilation * (kernel_size - 1 - j))
                for j in range(kernel_size)]
        slab = taps[0] if kernel_size == 1 else jnp.concatenate(taps, axis=1)
        return mm(slab, w) + b

    h = x_ref[...].astype(jnp.float32)                        # (bl, Cin0)
    for cfg in layer_cfgs:
        d, cin, cout = cfg["dilation"], cfg["cin"], cfg["cout"]
        w1 = w_ref[cfg["w1"]:cfg["w1"] + kernel_size * cin, :cout]
        b1 = w_ref[cfg["b1"]:cfg["b1"] + 1, :cout]
        w2 = w_ref[cfg["w2"]:cfg["w2"] + kernel_size * cout, :cout]
        b2 = w_ref[cfg["b2"]:cfg["b2"] + 1, :cout]

        hm = h.astype(mxu_dtype)                              # cast once per layer
        h1 = jnp.maximum(causal_conv(hm, w1.astype(mxu_dtype), b1, d), 0.0)
        # TODO(synk): Dropout2d layers are identity here (inference semantics).
        h2 = jnp.maximum(
            causal_conv(h1.astype(mxu_dtype), w2.astype(mxu_dtype), b2, d), 0.0)

        if cfg["ds"] is None:
            res = h                                           # exact f32 identity residual
        else:
            wd_off, bd_off = cfg["ds"]
            wd = w_ref[wd_off:wd_off + cin, :cout].astype(mxu_dtype)
            bd = w_ref[bd_off:bd_off + 1, :cout]
            res = mm(hm, wd) + bd

        h = jnp.maximum(h2 + res, 0.0)

    o_ref[...] = h.astype(o_ref.dtype)


# --------------------------- host-side wrapper -------------------------------

def _pack_params(params, kernel_size):
    """Packs every layer's weights/biases into one f32 (rows, max_cout) slab.

    Each segment's row count is padded to a multiple of 8 so all in-kernel
    static slices stay sublane-aligned.  Returns (slab, static layer cfgs)."""
    max_c = max(int(p["w1"].shape[-1]) for p in params)
    segs, layer_cfgs = [], []
    row = 0

    def add(mat):
        nonlocal row
        mat = jnp.asarray(mat, jnp.float32)
        r, c = mat.shape
        rp = -(-r // 8) * 8
        segs.append(jnp.pad(mat, ((0, rp - r), (0, max_c - c))))
        off = row
        row += rp
        return off

    for p in params:
        K, cin, cout = p["w1"].shape
        assert K == kernel_size
        cfg = dict(dilation=int(p["dilation"]), cin=int(cin), cout=int(cout),
                   w1=add(p["w1"].reshape(K * cin, cout)),
                   b1=add(p["b1"].reshape(1, cout)),
                   w2=add(p["w2"].reshape(K * cout, cout)),
                   b2=add(p["b2"].reshape(1, cout)),
                   ds=None)
        if p["wd"] is not None:
            cfg["ds"] = (add(p["wd"]), add(p["bd"].reshape(1, cout)))
        layer_cfgs.append(cfg)
    return jnp.concatenate(segs, axis=0), tuple(layer_cfgs)


def temporal_conv_net(x_ncl, params, kernel_size, *, mxu_dtype=jnp.float32,
                      batch_tiles=None):
    """x_ncl: (B, C_in, L) like PyTorch; returns (B, C_out, L).

    mxu_dtype=jnp.bfloat16 is recommended for production on v5e/v6e/v7x (f32
    accumulation and f32 elementwise math are kept); the f32 default preserves
    parity with the reference.  batch_tiles: grid steps over the batch
    (default 2 for even B -> both v7x TensorCores; use 1 on single-TC v5e/v6e).
    """
    B, Cin0, L = x_ncl.shape
    # NCL -> NLC -> flatten batch into the matmul M dimension.
    # TODO(synk): for very large B*L the NCL<->NLC transposes and an L-tiling
    # with a causal halo of dilation*(K-1) per layer should move in-kernel.
    x = jnp.transpose(x_ncl, (0, 2, 1)).astype(jnp.float32).reshape(B * L, Cin0)

    slab, layer_cfgs = _pack_params(params, kernel_size)
    cout_last = layer_cfgs[-1]["cout"]

    if batch_tiles is None:
        batch_tiles = 2 if B % 2 == 0 else 1
    if B % batch_tiles or ((B // batch_tiles) * L) % 8:
        batch_tiles = 1                        # one big step (always legal: full block)
    bl = (B // batch_tiles) * L

    kern = functools.partial(_tcn_kernel, layer_cfgs=layer_cfgs,
                             kernel_size=kernel_size, seq_len=L,
                             mxu_dtype=mxu_dtype)
    out = pl.pallas_call(
        kern,
        out_shape=jax.ShapeDtypeStruct((B * L, cout_last), jnp.float32),
        grid=(batch_tiles,),
        in_specs=[pl.BlockSpec((bl, Cin0), lambda g: (g, 0)),
                  pl.BlockSpec(slab.shape, lambda g: (0, 0))],   # VMEM-resident weights
        out_specs=pl.BlockSpec((bl, cout_last), lambda g: (g, 0)),
        compiler_params=pltpu.CompilerParams(
            dimension_semantics=("parallel",),
            # Small resident footprint; fits v7x's 64 MiB physical VMEM easily.
            vmem_limit_bytes=32 * 1024 * 1024),
    )(x, slab)
    return jnp.transpose(out.reshape(B, L, cout_last), (0, 2, 1))


# ---------------- parameter construction (plain JAX glue) -------------------

def _xavier_uniform(key, shape, fan_in, fan_out, gain):
    bound = gain * math.sqrt(6.0 / (fan_in + fan_out))
    return jax.random.uniform(key, shape, jnp.float32, -bound, bound)


def _bias_uniform(key, shape, fan_in):
    bound = 1.0 / math.sqrt(fan_in)
    return jax.random.uniform(key, shape, jnp.float32, -bound, bound)


def init_tcn_params(key, num_inputs, num_channels, kernel_size):
    """Mirrors TemporalBlock.init_weights.  weight_norm with g = ||v|| leaves the
    effective forward weight equal to v at init, so plain weights are used
    directly (trained PyTorch checkpoints must pre-materialize w = g*v/||v||
    and transpose to the (K, Cin, Cout) layout used here)."""
    gain = math.sqrt(2.0)
    params = []
    for i, out_c in enumerate(num_channels):
        in_c = num_inputs if i == 0 else num_channels[i - 1]
        dilation = 2 ** i
        key, k1, k2, k3, k4, k5, k6 = jax.random.split(key, 7)
        w1 = _xavier_uniform(k1, (kernel_size, in_c, out_c),
                             in_c * kernel_size, out_c * kernel_size, gain)
        b1 = _bias_uniform(k2, (1, out_c), in_c * kernel_size)
        w2 = _xavier_uniform(k3, (kernel_size, out_c, out_c),
                             out_c * kernel_size, out_c * kernel_size, gain)
        b2 = _bias_uniform(k4, (1, out_c), out_c * kernel_size)
        if in_c != out_c:
            wd = _xavier_uniform(k5, (in_c, out_c), in_c, out_c, gain)
            bd = _bias_uniform(k6, (1, out_c), in_c)
        else:
            wd, bd = None, None            # identity residual: no matmul at all
        params.append(dict(w1=w1, b1=b1, w2=w2, b2=b2, wd=wd, bd=bd,
                           dilation=dilation))
    return params


# ---------------- pure-JAX reference (for validation only) ------------------

def temporal_conv_net_reference(x_ncl, params, kernel_size):
    hp = jax.lax.Precision.HIGHEST
    x = jnp.transpose(x_ncl, (0, 2, 1)).astype(jnp.float32)
    K = kernel_size
    for p in params:
        d = int(p["dilation"])
        pad = d * (K - 1)

        def conv(h, w, b):
            L = h.shape[1]
            hpad = jnp.pad(h, ((0, 0), (pad, 0), (0, 0)))
            acc = None
            for j in range(K):
                tap = hpad[:, j * d:j * d + L, :]
                y = jnp.einsum("blc,cd->bld", tap, w[j], precision=hp)
                acc = y if acc is None else acc + y
            return acc + b[None]

        h1 = jax.nn.relu(conv(x, p["w1"], p["b1"]))
        h2 = jax.nn.relu(conv(h1, p["w2"], p["b2"]))
        if p["wd"] is not None:
            res = jnp.einsum("blc,cd->bld", x, p["wd"], precision=hp) + p["bd"][None]
        else:
            res = x
        x = jax.nn.relu(h2 + res)
    return jnp.transpose(x, (0, 2, 1))


if __name__ == "__main__":
    key = jax.random.PRNGKey(0)
    B, num_inputs, L = 2, 4, 16
    num_channels = (8, 8, 16)      # dilations 1, 2, 4; middle block has identity residual
    kernel_size = 2

    key, pkey, xkey = jax.random.split(key, 3)
    params = init_tcn_params(pkey, num_inputs, num_channels, kernel_size)
    x = jax.random.normal(xkey, (B, num_inputs, L), jnp.float32)

    # Exact f32 path (parity check against the pure-JAX reference).
    out = temporal_conv_net(x, params, kernel_size)
    out = jax.block_until_ready(out)
    assert out.shape == (B, num_channels[-1], L), out.shape

    ref = temporal_conv_net_reference(x, params, kernel_size)
    assert jnp.allclose(out, ref, rtol=5e-3, atol=5e-3), \
        float(jnp.max(jnp.abs(out - ref)))

    # bf16 MXU-operand path (recommended production default on v5e/v6e/v7x).
    out_bf16 = jax.block_until_ready(
        temporal_conv_net(x, params, kernel_size, mxu_dtype=jnp.bfloat16))
    assert out_bf16.shape == (B, num_channels[-1], L)
    assert bool(jnp.all(jnp.isfinite(out_bf16)))

    print("KERNEL_OK")
</pallas_src>

<mosaic_0001>
module attributes {stable_mosaic.version = 11 : i64} {
  func.func @_tcn_kernel(%arg0: i32, %arg1: memref<16x4xf32, #tpu.memory_space<vmem>>, %arg2: memref<184x16xf32, #tpu.memory_space<vmem>>, %arg3: memref<16x16xf32, #tpu.memory_space<vmem>>) attributes {dimension_semantics = [#tpu.dimension_semantics<parallel>], iteration_bounds = array<i64: 2>, scalar_prefetch = 0 : i64, scratch_operands = 0 : i64, tpu.core_type = #tpu.core_type<tc>, window_params = [{transform_indices = @transform_0, window_bounds = array<i64: 16, 4>}, {pipeline_mode = #tpu.pipeline_mode<synchronous>, transform_indices = @transform_1, window_bounds = array<i64: 184, 16>}, {transform_indices = @transform_2, window_bounds = array<i64: 16, 16>}]} {
    %0 = tpu.iota {dimensions = array<i32: 0>} : vector<16x1xi32>
    %c16_i32 = arith.constant 16 : i32
    %c0_i32 = arith.constant 0 : i32
    %1 = arith.cmpi eq, %c16_i32, %c0_i32 : i32
    %c1_i32 = arith.constant 1 : i32
    %2 = arith.select %1, %c1_i32, %c16_i32 : i32
    %3 = vector.broadcast %2 : i32 to vector<16x1xi32>
    %4 = arith.remsi %0, %3 : vector<16x1xi32>
    %c0_i32_0 = arith.constant 0 : i32
    %5 = vector.broadcast %c0_i32_0 : i32 to vector<16x1xi32>
    %6 = arith.cmpi ne, %4, %5 : vector<16x1xi32>
    %c0_i32_1 = arith.constant 0 : i32
    %7 = vector.broadcast %c0_i32_1 : i32 to vector<16x1xi32>
    %8 = arith.cmpi slt, %4, %7 : vector<16x1xi32>
    %c0_i32_2 = arith.constant 0 : i32
    %9 = arith.cmpi slt, %2, %c0_i32_2 : i32
    %10 = vector.broadcast %9 : i1 to vector<16x1xi1>
    %11 = vector.broadcast %10 : vector<16x1xi1> to vector<16x1xi1>
    %12 = arith.xori %8, %11 : vector<16x1xi1>
    %13 = arith.andi %12, %6 : vector<16x1xi1>
    %14 = vector.broadcast %2 : i32 to vector<16x1xi32>
    %15 = arith.addi %4, %14 : vector<16x1xi32>
    %16 = arith.select %13, %15, %4 : vector<16x1xi1>, vector<16x1xi32>
    %c0 = arith.constant 0 : index
    %c0_3 = arith.constant 0 : index
    %17 = vector.load %arg1[%c0, %c0_3] : memref<16x4xf32, #tpu.memory_space<vmem>>, vector<16x4xf32>
    %c0_4 = arith.constant 0 : index
    %c0_5 = arith.constant 0 : index
    %18 = vector.load %arg2[%c0_4, %c0_5] : memref<184x16xf32, #tpu.memory_space<vmem>>, vector<8x8xf32>
    %c8 = arith.constant 8 : index
    %c0_6 = arith.constant 0 : index
    %19 = vector.load %arg2[%c8, %c0_6] : memref<184x16xf32, #tpu.memory_space<vmem>>, vector<1x8xf32>
    %c16 = arith.constant 16 : index
    %c0_7 = arith.constant 0 : index
    %20 = vector.load %arg2[%c16, %c0_7] : memref<184x16xf32, #tpu.memory_space<vmem>>, vector<16x8xf32>
    %c32 = arith.constant 32 : index
    %c0_8 = arith.constant 0 : index
    %21 = vector.load %arg2[%c32, %c0_8] : memref<184x16xf32, #tpu.memory_space<vmem>>, vector<1x8xf32>
    %22 = vector.extract_strided_slice %17 {offsets = [15, 0], sizes = [1, 4], strides = [1, 1]} : vector<16x4xf32> to vector<1x4xf32>
    %23 = vector.extract_strided_slice %17 {offsets = [0, 0], sizes = [15, 4], strides = [1, 1]} : vector<16x4xf32> to vector<15x4xf32>
    %24 = tpu.concatenate %22, %23 in 0 : vector<1x4xf32>, vector<15x4xf32> -> vector<16x4xf32>
    %c1_i32_9 = arith.constant 1 : i32
    %25 = vector.broadcast %c1_i32_9 : i32 to vector<16x1xi32>
    %26 = arith.cmpi sge, %16, %25 : vector<16x1xi32>
    %cst = arith.constant 0.000000e+00 : f32
    %27 = vector.broadcast %cst : f32 to vector<16x4xf32>
    %28 = vector.shape_cast %26 : vector<16x1xi1> to vector<16x1xi1>
    %29 = vector.broadcast %28 : vector<16x1xi1> to vector<16x4xi1>
    %30 = arith.select %29, %24, %27 : vector<16x4xi1>, vector<16x4xf32>
    %31 = tpu.concatenate %30, %17 in 1 : vector<16x4xf32>, vector<16x4xf32> -> vector<16x8xf32>
    %cst_10 = arith.constant dense<0.000000e+00> : vector<16x8xf32>
    %32 = tpu.matmul %31, %18, %cst_10 {dimension_numbers = #tpu.dot_dimension_numbers<[1], [0], [0], [1], [0, 0, 1, 1], [], []>, precision = #tpu.contract_precision<fp32>} : vector<16x8xf32>, vector<8x8xf32>, vector<16x8xf32> -> vector<16x8xf32>
    %33 = vector.broadcast %19 : vector<1x8xf32> to vector<16x8xf32>
    %34 = arith.addf %32, %33 : vector<16x8xf32>
    %cst_11 = arith.constant 0.000000e+00 : f32
    %35 = vector.broadcast %cst_11 : f32 to vector<16x8xf32>
    %36 = arith.maximumf %34, %35 : vector<16x8xf32>
    %37 = vector.extract_strided_slice %36 {offsets = [15, 0], sizes = [1, 8], strides = [1, 1]} : vector<16x8xf32> to vector<1x8xf32>
    %38 = vector.extract_strided_slice %36 {offsets = [0, 0], sizes = [15, 8], strides = [1, 1]} : vector<16x8xf32> to vector<15x8xf32>
    %39 = tpu.concatenate %37, %38 in 0 : vector<1x8xf32>, vector<15x8xf32> -> vector<16x8xf32>
    %c1_i32_12 = arith.constant 1 : i32
    %40 = vector.broadcast %c1_i32_12 : i32 to vector<16x1xi32>
    %41 = arith.cmpi sge, %16, %40 : vector<16x1xi32>
    %cst_13 = arith.constant 0.000000e+00 : f32
    %42 = vector.broadcast %cst_13 : f32 to vector<16x8xf32>
    %43 = vector.shape_cast %41 : vector<16x1xi1> to vector<16x1xi1>
    %44 = vector.broadcast %43 : vector<16x1xi1> to vector<16x8xi1>
    %45 = arith.select %44, %39, %42 : vector<16x8xi1>, vector<16x8xf32>
    %46 = tpu.concatenate %45, %36 in 1 : vector<16x8xf32>, vector<16x8xf32> -> vector<16x16xf32>
    %cst_14 = arith.constant dense<0.000000e+00> : vector<16x8xf32>
    %47 = tpu.matmul %46, %20, %cst_14 {dimension_numbers = #tpu.dot_dimension_numbers<[1], [0], [0], [1], [0, 0, 1, 1], [], []>, precision = #tpu.contract_precision<fp32>} : vector<16x16xf32>, vector<16x8xf32>, vector<16x8xf32> -> vector<16x8xf32>
    %48 = vector.broadcast %21 : vector<1x8xf32> to vector<16x8xf32>
    %49 = arith.addf %47, %48 : vector<16x8xf32>
    %cst_15 = arith.constant 0.000000e+00 : f32
    %50 = vector.broadcast %cst_15 : f32 to vector<16x8xf32>
    %51 = arith.maximumf %49, %50 : vector<16x8xf32>
    %c40 = arith.constant 40 : index
    %c0_16 = arith.constant 0 : index
    %52 = vector.load %arg2[%c40, %c0_16] : memref<184x16xf32, #tpu.memory_space<vmem>>, vector<4x8xf32>
    %c48 = arith.constant 48 : index
    %c0_17 = arith.constant 0 : index
    %53 = vector.load %arg2[%c48, %c0_17] : memref<184x16xf32, #tpu.memory_space<vmem>>, vector<1x8xf32>
    %cst_18 = arith.constant dense<0.000000e+00> : vector<16x8xf32>
    %54 = tpu.matmul %17, %52, %cst_18 {dimension_numbers = #tpu.dot_dimension_numbers<[1], [0], [0], [1], [0, 0, 1, 1], [], []>, precision = #tpu.contract_precision<fp32>} : vector<16x4xf32>, vector<4x8xf32>, vector<16x8xf32> -> vector<16x8xf32>
    %55 = vector.broadcast %53 : vector<1x8xf32> to vector<16x8xf32>
    %56 = arith.addf %54, %55 : vector<16x8xf32>
    %57 = arith.addf %51, %56 : vector<16x8xf32>
    %cst_19 = arith.constant 0.000000e+00 : f32
    %58 = vector.broadcast %cst_19 : f32 to vector<16x8xf32>
    %59 = arith.maximumf %57, %58 : vector<16x8xf32>
    %c56 = arith.constant 56 : index
    %c0_20 = arith.constant 0 : index
    %60 = vector.load %arg2[%c56, %c0_20] : memref<184x16xf32, #tpu.memory_space<vmem>>, vector<16x8xf32>
    %c72 = arith.constant 72 : index
    %c0_21 = arith.constant 0 : index
    %61 = vector.load %arg2[%c72, %c0_21] : memref<184x16xf32, #tpu.memory_space<vmem>>, vector<1x8xf32>
    %c80 = arith.constant 80 : index
    %c0_22 = arith.constant 0 : index
    %62 = vector.load %arg2[%c80, %c0_22] : memref<184x16xf32, #tpu.memory_space<vmem>>, vector<16x8xf32>
    %c96 = arith.constant 96 : index
    %c0_23 = arith.constant 0 : index
    %63 = vector.load %arg2[%c96, %c0_23] : memref<184x16xf32, #tpu.memory_space<vmem>>, vector<1x8xf32>
    %64 = vector.extract_strided_slice %59 {offsets = [14, 0], sizes = [2, 8], strides = [1, 1]} : vector<16x8xf32> to vector<2x8xf32>
    %65 = vector.extract_strided_slice %59 {offsets = [0, 0], sizes = [14, 8], strides = [1, 1]} : vector<16x8xf32> to vector<14x8xf32>
    %66 = tpu.concatenate %64, %65 in 0 : vector<2x8xf32>, vector<14x8xf32> -> vector<16x8xf32>
    %c2_i32 = arith.constant 2 : i32
    %67 = vector.broadcast %c2_i32 : i32 to vector<16x1xi32>
    %68 = arith.cmpi sge, %16, %67 : vector<16x1xi32>
    %cst_24 = arith.constant 0.000000e+00 : f32
    %69 = vector.broadcast %cst_24 : f32 to vector<16x8xf32>
    %70 = vector.shape_cast %68 : vector<16x1xi1> to vector<16x1xi1>
    %71 = vector.broadcast %70 : vector<16x1xi1> to vector<16x8xi1>
    %72 = arith.select %71, %66, %69 : vector<16x8xi1>, vector<16x8xf32>
    %73 = tpu.concatenate %72, %59 in 1 : vector<16x8xf32>, vector<16x8xf32> -> vector<16x16xf32>
    %cst_25 = arith.constant dense<0.000000e+00> : vector<16x8xf32>
    %74 = tpu.matmul %73, %60, %cst_25 {dimension_numbers = #tpu.dot_dimension_numbers<[1], [0], [0], [1], [0, 0, 1, 1], [], []>, precision = #tpu.contract_precision<fp32>} : vector<16x16xf32>, vector<16x8xf32>, vector<16x8xf32> -> vector<16x8xf32>
    %75 = vector.broadcast %61 : vector<1x8xf32> to vector<16x8xf32>
    %76 = arith.addf %74, %75 : vector<16x8xf32>
    %cst_26 = arith.constant 0.000000e+00 : f32
    %77 = vector.broadcast %cst_26 : f32 to vector<16x8xf32>
    %78 = arith.maximumf %76, %77 : vector<16x8xf32>
    %79 = vector.extract_strided_slice %78 {offsets = [14, 0], sizes = [2, 8], strides = [1, 1]} : vector<16x8xf32> to vector<2x8xf32>
    %80 = vector.extract_strided_slice %78 {offsets = [0, 0], sizes = [14, 8], strides = [1, 1]} : vector<16x8xf32> to vector<14x8xf32>
    %81 = tpu.concatenate %79, %80 in 0 : vector<2x8xf32>, vector<14x8xf32> -> vector<16x8xf32>
    %c2_i32_27 = arith.constant 2 : i32
    %82 = vector.broadcast %c2_i32_27 : i32 to vector<16x1xi32>
    %83 = arith.cmpi sge, %16, %82 : vector<16x1xi32>
    %cst_28 = arith.constant 0.000000e+00 : f32
    %84 = vector.broadcast %cst_28 : f32 to vector<16x8xf32>
    %85 = vector.shape_cast %83 : vector<16x1xi1> to vector<16x1xi1>
    %86 = vector.broadcast %85 : vector<16x1xi1> to vector<16x8xi1>
    %87 = arith.select %86, %81, %84 : vector<16x8xi1>, vector<16x8xf32>
    %88 = tpu.concatenate %87, %78 in 1 : vector<16x8xf32>, vector<16x8xf32> -> vector<16x16xf32>
    %cst_29 = arith.constant dense<0.000000e+00> : vector<16x8xf32>
    %89 = tpu.matmul %88, %62, %cst_29 {dimension_numbers = #tpu.dot_dimension_numbers<[1], [0], [0], [1], [0, 0, 1, 1], [], []>, precision = #tpu.contract_precision<fp32>} : vector<16x16xf32>, vector<16x8xf32>, vector<16x8xf32> -> vector<16x8xf32>
    %90 = vector.broadcast %63 : vector<1x8xf32> to vector<16x8xf32>
    %91 = arith.addf %89, %90 : vector<16x8xf32>
    %cst_30 = arith.constant 0.000000e+00 : f32
    %92 = vector.broadcast %cst_30 : f32 to vector<16x8xf32>
    %93 = arith.maximumf %91, %92 : vector<16x8xf32>
    %94 = arith.addf %93, %59 : vector<16x8xf32>
    %cst_31 = arith.constant 0.000000e+00 : f32
    %95 = vector.broadcast %cst_31 : f32 to vector<16x8xf32>
    %96 = arith.maximumf %94, %95 : vector<16x8xf32>
    %c104 = arith.constant 104 : index
    %c0_32 = arith.constant 0 : index
    %97 = vector.load %arg2[%c104, %c0_32] : memref<184x16xf32, #tpu.memory_space<vmem>>, vector<16x16xf32>
    %c120 = arith.constant 120 : index
    %c0_33 = arith.constant 0 : index
    %98 = vector.load %arg2[%c120, %c0_33] : memref<184x16xf32, #tpu.memory_space<vmem>>, vector<1x16xf32>
    %c128 = arith.constant 128 : index
    %c0_34 = arith.constant 0 : index
    %99 = vector.load %arg2[%c128, %c0_34] : memref<184x16xf32, #tpu.memory_space<vmem>>, vector<32x16xf32>
    %c160 = arith.constant 160 : index
    %c0_35 = arith.constant 0 : index
    %100 = vector.load %arg2[%c160, %c0_35] : memref<184x16xf32, #tpu.memory_space<vmem>>, vector<1x16xf32>
    %101 = vector.extract_strided_slice %96 {offsets = [12, 0], sizes = [4, 8], strides = [1, 1]} : vector<16x8xf32> to vector<4x8xf32>
    %102 = vector.extract_strided_slice %96 {offsets = [0, 0], sizes = [12, 8], strides = [1, 1]} : vector<16x8xf32> to vector<12x8xf32>
    %103 = tpu.concatenate %101, %102 in 0 : vector<4x8xf32>, vector<12x8xf32> -> vector<16x8xf32>
    %c4_i32 = arith.constant 4 : i32
    %104 = vector.broadcast %c4_i32 : i32 to vector<16x1xi32>
    %105 = arith.cmpi sge, %16, %104 : vector<16x1xi32>
    %cst_36 = arith.constant 0.000000e+00 : f32
    %106 = vector.broadcast %cst_36 : f32 to vector<16x8xf32>
    %107 = vector.shape_cast %105 : vector<16x1xi1> to vector<16x1xi1>
    %108 = vector.broadcast %107 : vector<16x1xi1> to vector<16x8xi1>
    %109 = arith.select %108, %103, %106 : vector<16x8xi1>, vector<16x8xf32>
    %110 = tpu.concatenate %109, %96 in 1 : vector<16x8xf32>, vector<16x8xf32> -> vector<16x16xf32>
    %cst_37 = arith.constant dense<0.000000e+00> : vector<16x16xf32>
    %111 = tpu.matmul %110, %97, %cst_37 {dimension_numbers = #tpu.dot_dimension_numbers<[1], [0], [0], [1], [0, 0, 1, 1], [], []>, precision = #tpu.contract_precision<fp32>} : vector<16x16xf32>, vector<16x16xf32>, vector<16x16xf32> -> vector<16x16xf32>
    %112 = vector.broadcast %98 : vector<1x16xf32> to vector<16x16xf32>
    %113 = arith.addf %111, %112 : vector<16x16xf32>
    %cst_38 = arith.constant 0.000000e+00 : f32
    %114 = vector.broadcast %cst_38 : f32 to vector<16x16xf32>
    %115 = arith.maximumf %113, %114 : vector<16x16xf32>
    %116 = vector.extract_strided_slice %115 {offsets = [12, 0], sizes = [4, 16], strides = [1, 1]} : vector<16x16xf32> to vector<4x16xf32>
    %117 = vector.extract_strided_slice %115 {offsets = [0, 0], sizes = [12, 16], strides = [1, 1]} : vector<16x16xf32> to vector<12x16xf32>
    %118 = tpu.concatenate %116, %117 in 0 : vector<4x16xf32>, vector<12x16xf32> -> vector<16x16xf32>
    %c4_i32_39 = arith.constant 4 : i32
    %119 = vector.broadcast %c4_i32_39 : i32 to vector<16x1xi32>
    %120 = arith.cmpi sge, %16, %119 : vector<16x1xi32>
    %cst_40 = arith.constant 0.000000e+00 : f32
    %121 = vector.broadcast %cst_40 : f32 to vector<16x16xf32>
    %122 = vector.shape_cast %120 : vector<16x1xi1> to vector<16x1xi1>
    %123 = vector.broadcast %122 : vector<16x1xi1> to vector<16x16xi1>
    %124 = arith.select %123, %118, %121 : vector<16x16xi1>, vector<16x16xf32>
    %125 = tpu.concatenate %124, %115 in 1 : vector<16x16xf32>, vector<16x16xf32> -> vector<16x32xf32>
    %cst_41 = arith.constant dense<0.000000e+00> : vector<16x16xf32>
    %126 = tpu.matmul %125, %99, %cst_41 {dimension_numbers = #tpu.dot_dimension_numbers<[1], [0], [0], [1], [0, 0, 1, 1], [], []>, precision = #tpu.contract_precision<fp32>} : vector<16x32xf32>, vector<32x16xf32>, vector<16x16xf32> -> vector<16x16xf32>
    %127 = vector.broadcast %100 : vector<1x16xf32> to vector<16x16xf32>
    %128 = arith.addf %126, %127 : vector<16x16xf32>
    %cst_42 = arith.constant 0.000000e+00 : f32
    %129 = vector.broadcast %cst_42 : f32 to vector<16x16xf32>
    %130 = arith.maximumf %128, %129 : vector<16x16xf32>
    %c168 = arith.constant 168 : index
    %c0_43 = arith.constant 0 : index
    %131 = vector.load %arg2[%c168, %c0_43] : memref<184x16xf32, #tpu.memory_space<vmem>>, vector<8x16xf32>
    %c176 = arith.constant 176 : index
    %c0_44 = arith.constant 0 : index
    %132 = vector.load %arg2[%c176, %c0_44] : memref<184x16xf32, #tpu.memory_space<vmem>>, vector<1x16xf32>
    %cst_45 = arith.constant dense<0.000000e+00> : vector<16x16xf32>
    %133 = tpu.matmul %96, %131, %cst_45 {dimension_numbers = #tpu.dot_dimension_numbers<[1], [0], [0], [1], [0, 0, 1, 1], [], []>, precision = #tpu.contract_precision<fp32>} : vector<16x8xf32>, vector<8x16xf32>, vector<16x16xf32> -> vector<16x16xf32>
    %134 = vector.broadcast %132 : vector<1x16xf32> to vector<16x16xf32>
    %135 = arith.addf %133, %134 : vector<16x16xf32>
    %136 = arith.addf %130, %135 : vector<16x16xf32>
    %cst_46 = arith.constant 0.000000e+00 : f32
    %137 = vector.broadcast %cst_46 : f32 to vector<16x16xf32>
    %138 = arith.maximumf %136, %137 : vector<16x16xf32>
    %c0_47 = arith.constant 0 : index
    %c0_48 = arith.constant 0 : index
    %139 = vector.load %arg3[%c0_47, %c0_48] : memref<16x16xf32, #tpu.memory_space<vmem>>, vector<16x16xf32>
    tpu.vector_store %arg3[%c0_47, %c0_48], %138 {strides = array<i32>} : memref<16x16xf32, #tpu.memory_space<vmem>>, vector<16x16xf32>,
    return
  }
  func.func @transform_0(%arg0: i32) -> (i32, i32) {
    %c0_i32 = arith.constant 0 : i32
    %c0_i32_0 = arith.constant 0 : i32
    return %arg0, %c0_i32 : i32, i32
  }
  func.func @transform_1(%arg0: i32) -> (i32, i32) {
    %c0_i32 = arith.constant 0 : i32
    %c0_i32_0 = arith.constant 0 : i32
    %c0_i32_1 = arith.constant 0 : i32
    return %c0_i32, %c0_i32_0 : i32, i32
  }
  func.func @transform_2(%arg0: i32) -> (i32, i32) {
    %c0_i32 = arith.constant 0 : i32
    %c0_i32_0 = arith.constant 0 : i32
    return %arg0, %c0_i32 : i32, i32
  }
}

</mosaic_0001>

<bundles_post_ra>
// kernel: tpu_custom_call.1
= control target key start
LH: loop header
LB: loop body
LE: loop exit
PB: predicated region body
PF: predicated region fallthrough
CT: control target
= control target key end

     0   :  { %s2038_s9 = smov 0   ;;  %s2227_s0 = inlined_call_operand.vmem [shape: f32[32,4], index: 0, kind: input, shape index: {}]   ;;  %s2228_s1 = inlined_call_operand.vmem [shape: f32[184,16], index: 1, kind: input, shape index: {}]   ;;  %s2229_s2 = inlined_call_operand.vmem [shape: f32[32,16], index: 2, kind: output, shape index: {}]  }
   0x1 LB: > { %s1982_s10 = sadd.s32 4294967295, %s2018_s9   ;;  %p1986_p0 = scmp.ge.s32.totalorder %s2018_s9, 1  ;;  %s2018_s9 = sphi %s2038_s9, %s12_s9  }
   0x2   : > { %p113_p1 = scmp.lt.s32.totalorder %s2018_s9, 3 }
   0x4   : > { %p114_p2 = pnand %p1986_p0, %p113_p1 }
   0x5   : > { %s1987_s11 = sshll.u32 (!%p114_p2), %s1982_s10, 1  ;;  %s2020_s16 = smov (!%p114_p2), 4  }
   0x6   : > { %117 = sbr.rel (%p114_p2) target bundleno = 1716 (0x6b4), region = 28  ;;  %p136_p3 = scmp.lt.s32.totalorder (!%p114_p2), %s1987_s11, 3 }
   0x7   : > { %s2021_s23 = smov (!%p114_p2), 8   ;;  %s2022_s25 = smov (!%p114_p2), 16  }
   0xb   : > { %s2231_s11 = smov (!%p136_p3, %s1987_s11), 3  ;;  %v176_v2 = vld [vmem:[%s2228_s1] sm:$0xff]  ;;  %vm185_vm0 = vcmask 1040384   ;;  %v147_v12 = vlaneseq  ;;  %vm205_vm2 = vcmask 31744   ;;  %vm209_vm3 = vcmask 64512   ;;  %v179_v34 = vld [vmem:[%s2228_s1 + $0x18] sm:$0xff] }
   0xc   : > { %s1988_s12 = sshll.u32 %s2231_s11, 3  ;;  %v231_v3 = vand.u32 4294901760, %v176_v2  ;;  %v2004_v33 = vld [vmem:[%s2228_s1 + $0x8] ss:$0 sm:$0xff]  ;;  %v436_v36 = vand.u32 4294901760, %v179_v34  ;;  %vm621_vm4 = vcmask 1043456  }
   0xd   : > { %s139_s15 = scalar_lea.vmem %s2227_s0, %s1988_s12  ;;  %v148_v13 = vshrl.u32 %v147_v12, 7  ;;  %vm415_vm5 = vcmask 130048   ;;  %vm816_vm6 = vcmask 1041408   ;;  %vm1511_vm9 = vcmask 261120   ;;  %s145_s17 = scalar_lea.vmem %s2229_s2, %s1988_s12 }
   0xe   : > { %v2054_v0 = vld [vmem:[%s139_s15] sm:$0xff]  ;;  %v2057_v1 = vld [vmem:[%s139_s15 + $0x8] sm:$0xff]  ;;  %v266_v6 = vsub.f32 %v176_v2, %v231_v3  ;;  %325 = vmatpush.msra.mxu3 %v231_v3  ;;  %232 = vmatpush.msra.mxu0 %v231_v3  ;;  %v472_v37 = vsub.f32 %v179_v34, %v436_v36 }
   0xf   : > { %199 = vrot.lane.b32.xlu0 %v2054_v0, %s2020_s16  ;;  %v186_v4 = vrot.slane %v2054_v0, 7  ;;  %v182_v5 = vrot.slane %v2057_v1, 7  ;;  %v2067_v14 = vand.u32 15, %v148_v13  ;;  %v614_v13 = vld [vmem:[%s2228_s1 + $0x28] sm:$0xf] }
  0x10   : > { %v267_v7 = vand.u32 4294901760, %v266_v6  ;;  %297 = vmatpush.msra.mxu2 %v266_v6  ;;  %v473_v39 = vand.u32 4294901760, %v472_v37 }
  0x11   : > { %v190_v8 = vsel %vm185_vm0, %v182_v5, %v186_v4  ;;  %v187_v11 = vsel %vm185_vm0, %v186_v4, %v182_v5  ;;  %vm191_vm1 = vcmp.ge.s32.totalorder %v2067_v14, 1  ;;  %vm822_vm7 = vcmp.ge.s32.totalorder %v2067_v14, 2 }
  0x12   : > { %v268_v9 = vsub.f32 %v266_v6, %v267_v7  ;;  %357 = vmatpush.msrb.mxu0 %v267_v7  ;;  %v197_v15 = vsel %vm191_vm1, %v190_v8, 0.0  ;;  %437 = vmatpush.msrb.mxu2 %v436_v36  ;;  %v474_v41 = vsub.f32 %v472_v37, %v473_v39  ;;  %v178_v7 = vld [vmem:[%s2228_s1 + $0x10] sm:$0xff]  ;;  %vm1276_vm8 = vcmp.ge.s32.totalorder %v2067_v14, 4 }
  0x13   : > { %v438_v8 = vand.u32 4294901760, %v178_v7 }
  0x14   : > { %v269_v10 = vand.u32 4294901760, %v268_v9  ;;  %v475_v45 = vand.u32 4294901760, %v474_v41 }
  0x15   : > { %v478_v9 = vsub.f32 %v178_v7, %v438_v8  ;;  %439 = vmatpush.msrb.mxu2 %v438_v8 }
  0x16   : > { %270 = vmatpush.msra.mxu1 %v269_v10  ;;  %476 = vmatpush.msrb.mxu3 %v475_v45 }
  0x17   : > { %201 = vrot.lane.b32.xlu0 %v2057_v1, %s2020_s16  ;;  %v479_v10 = vand.u32 4294901760, %v478_v9 }
  0x18   : > { %383 = vmatpush.msrb.mxu1 %v231_v3 }
  0x81   : > { %v200_v16 = vpop.permute.xlu0 %199 }
  0x82   : > { %v206_v17 = vsel %vm205_vm2, %v197_v15, %v200_v16  ;;  %v623_v15 = vsel %vm621_vm4, %v614_v13, 0 }
  0x83   : > { %v211_v18 = vsel %vm209_vm3, %v206_v17, 0  ;;  %v640_v16 = vand.u32 4294901760, %v623_v15 }
  0x84   : > { %v233_v19 = vand.u32 4294901760, %v211_v18 }
  0x85   : > { %v675_v17 = vsub.f32 %v623_v15, %v640_v16 }
  0x86   : > { %v234_v20 = vsub.f32 %v211_v18, %v233_v19  ;;  %272 = vmatmul.f32.vlgmr.msra.gmra.mxu1 %v233_v19 }
  0x87   : > { %538 = vmatpush.msra.mxu1 %v436_v36  ;;  %v676_v18 = vand.u32 4294901760, %v675_v17 }
  0x88   : > { %300 = vmatmul.f32.vlgmr.msra.gmra.mxu2 %v234_v20  ;;  %v235_v21 = vand.u32 4294901760, %v234_v20 }
  0x89   : > { %v202_v22 = vpop.permute.xlu0 %201  ;;  %540 = vmatpush.msra.mxu1 %v438_v8  ;;  %571 = vmatpush.msra.mxu2 %v473_v39 }
  0x8a   : > { %v207_v23 = vsel %vm205_vm2, %v187_v11, %v202_v22  ;;  %329 = vmatmul.f32.vlgmr.msra.gmra.mxu3 %v235_v21  ;;  %v236_v24 = vsub.f32 %v234_v20, %v235_v21  ;;  %v480_v11 = vsub.f32 %v478_v9, %v479_v10  ;;  %v617_v21 = vsel %vm205_vm2, %v2054_v0, 0 }
  0x8b   : > { %v214_v25 = vsel %vm209_vm3, %v207_v23, 0  ;;  %575 = vmatpush.msra.mxu2 %v479_v10  ;;  %v619_v0 = vsel %vm205_vm2, %v2057_v1, 0 }
  0x8c   : > { %v241_v26 = vand.u32 4294901760, %v214_v25  ;;  %v237_v27 = vand.u32 4294901760, %v236_v24  ;;  %v481_v12 = vand.u32 4294901760, %v480_v11 }
  0x8e   : > { %v242_v28 = vsub.f32 %v214_v25, %v241_v26  ;;  %238 = vmatmul.f32.vlgmr.msra.gmra.mxu0 %v237_v27  ;;  %276 = vmatmul.f32.gmra.mxu1 %v241_v26 }
  0x8f   : > { %508 = vmatpush.msra.mxu0 %v472_v37  ;;  %482 = vmatpush.msrb.mxu3 %v481_v12 }
  0x90   : > { %305 = vmatmul.f32.gmra.mxu2 %v242_v28  ;;  %v243_v29 = vand.u32 4294901760, %v242_v28 }
  0x91   : > { %511 = vmatpush.msra.mxu0 %v478_v9  ;;  %600 = vmatpush.msra.mxu3 %v436_v36  ;;  %v650_v36 = vand.u32 4294901760, %v619_v0 }
  0x92   : > { %335 = vmatmul.f32.gmra.mxu3 %v243_v29  ;;  %v244_v30 = vsub.f32 %v242_v28, %v243_v29 }
  0x93   : > { %602 = vmatpush.msra.mxu3 %v438_v8 }
  0x94   : > { %v245_v31 = vand.u32 4294901760, %v244_v30 }
  0x96   : > { %246 = vmatmul.f32.gmra.mxu0 %v245_v31  ;;  %385 = vmatmul.f32.vlgmr.msrb.gmra.mxu1 %v233_v19 }
  0x9e   : > { %359 = vmatmul.f32.vlgmr.msrb.gmra.mxu0 %v233_v19  ;;  %389 = vmatmul.f32.gmra.mxu1 %v241_v26  ;;  %v677_v19 = vsub.f32 %v675_v17, %v676_v18 }
  0x9f   : > { %641 = vmatpush.msrb.mxu0 %v640_v16 }
  0xa0   : > { %v678_v20 = vand.u32 4294901760, %v677_v19 }
  0xa2   : > { %679 = vmatpush.msrb.mxu1 %v678_v20 }
  0xa6   : > { %363 = vmatmul.f32.gmra.mxu0 %v241_v26  ;;  %v642_v26 = vand.u32 4294901760, %v617_v21 }
  0xa8   : > { %v643_v29 = vsub.f32 %v617_v21, %v642_v26 }
 0x103   : > { %v273_v32 = vpop.f32.mrf.mxu1 }
 0x10b   : > { %v239_v35 = vpop.f32.mrf.mxu0  ;;  %v277_v40 = vpop.f32.mrf.mxu1 }
 0x10c   : > { %v240_v38 = vadd.f32 %v2004_v33, %v239_v35  ;;  %v301_v43 = vpop.f32.mrf.mxu2  ;;  %v644_v35 = vand.u32 4294901760, %v643_v29 }
 0x10d   : > { %v330_v48 = vpop.f32.mrf.mxu3 }
 0x10e   : > { %v274_v42 = vadd.f32 %v273_v32, %v240_v38  ;;  %v645_v41 = vsub.f32 %v643_v29, %v644_v35 }
 0x110   : > { %v302_v46 = vadd.f32 %v301_v43, %v274_v42 }
 0x112   : > { %v331_v49 = vadd.f32 %v330_v48, %v302_v46 }
 0x113   : > { %v247_v44 = vpop.f32.mrf.mxu0  ;;  %v386_v51 = vpop.f32.mrf.mxu1 }
 0x114   : > { %v248_v47 = vadd.f32 %v2004_v33, %v247_v44  ;;  %v306_v54 = vpop.f32.mrf.mxu2  ;;  %v646_v44 = vand.u32 4294901760, %v645_v41 }
 0x115   : > { %v336_v58 = vpop.f32.mrf.mxu3 }
 0x116   : > { %v278_v50 = vadd.f32 %v277_v40, %v248_v47  ;;  %v651_v40 = vsub.f32 %v619_v0, %v650_v36 }
 0x118   : > { %v307_v55 = vadd.f32 %v306_v54, %v278_v50  ;;  %v652_v45 = vand.u32 4294901760, %v651_v40 }
 0x11a   : > { %v337_v59 = vadd.f32 %v336_v58, %v307_v55  ;;  %v653_v46 = vsub.f32 %v651_v40, %v652_v45  ;;  %v2005_v58 = vld [vmem:[%s2228_s1 + $0x20] ss:$0 sm:$0xff] }
 0x11b   : > { %v360_v52 = vpop.f32.mrf.mxu0  ;;  %v390_v62 = vpop.f32.mrf.mxu1 }
 0x11c   : > { %v361_v53 = vadd.f32 %v360_v52, %v331_v49  ;;  %v654_v47 = vand.u32 4294901760, %v653_v46 }
 0x11e   : > { %v387_v56 = vadd.f32 %v386_v51, %v361_v53 }
 0x120   : > { %v393_v57 = vmax.f32 %v387_v56, 0.0 }
 0x122   : > { %406 = vrot.lane.b32.xlu1 %v393_v57, %s2021_s23  ;;  %v399_v3 = vrot.slane %v393_v57, 7 }
 0x123   : > { %v364_v60 = vpop.f32.mrf.mxu0 }
 0x124   : > { %v365_v61 = vadd.f32 %v364_v60, %v337_v59 }
 0x126   : > { %v391_v63 = vadd.f32 %v390_v62, %v365_v61 }
 0x128   : > { %v394_v2 = vmax.f32 %v391_v63, 0.0  ;;  %v807_v63 = vld [vmem:[%s2228_s1 + $0x40] sm:$0xff] }
 0x12a   : > { %v396_v4 = vrot.slane %v394_v2, 7  ;;  %408 = vrot.lane.b32.xlu1 %v394_v2, %s2021_s23 }
 0x12c   : > { %v403_v5 = vsel %vm185_vm0, %v396_v4, %v399_v3  ;;  %v400_v6 = vsel %vm185_vm0, %v399_v3, %v396_v4  ;;  %v859_v4 = vand.u32 4294901760, %v807_v63 }
 0x12d   : > { %v404_v23 = vsel %vm191_vm1, %v403_v5, 0.0  ;;  %v2006_v5 = vld [vmem:[%s2228_s1 + $0x30] ss:$0 sm:$0xff] }
 0x12e   : > { %v895_v8 = vsub.f32 %v807_v63, %v859_v4 }
 0x130   : > { %v896_v11 = vand.u32 4294901760, %v895_v8 }
 0x132   : > { %v897_v13 = vsub.f32 %v895_v8, %v896_v11 }
 0x194   : > { %v407_v22 = vpop.permute.xlu1 %406 }
 0x195   : > { %v412_v24 = vsel %vm209_vm3, %v404_v23, %v407_v22 }
 0x196   : > { %v417_v25 = vsel %vm415_vm5, %v412_v24, 0 }
 0x197   : > { %v440_v27 = vand.u32 4294901760, %v417_v25 }
 0x199   : > { %v441_v28 = vsub.f32 %v417_v25, %v440_v27  ;;  %484 = vmatmul.f32.vlgmr.msrb.gmra.mxu3 %v440_v27 }
 0x19a   : > { %734 = vmatpush.msrb.mxu3 %v640_v16 }
 0x19b   : > { %514 = vmatmul.f32.vlgmr.msra.gmra.mxu0 %v441_v28  ;;  %v442_v30 = vand.u32 4294901760, %v441_v28 }
 0x19c   : > { %v409_v31 = vpop.permute.xlu1 %408  ;;  %766 = vmatpush.msra.mxu0 %v676_v18  ;;  %v898_v18 = vand.u32 4294901760, %v897_v13  ;;  %v2007_v13 = vld [vmem:[%s2228_s1 + $0x48] ss:$0 sm:$0xff] }
 0x19d   : > { %v413_v32 = vsel %vm209_vm3, %v400_v6, %v409_v31  ;;  %544 = vmatmul.f32.vlgmr.msra.gmra.mxu1 %v442_v30  ;;  %v443_v33 = vsub.f32 %v441_v28, %v442_v30 }
 0x19e   : > { %v420_v34 = vsel %vm415_vm5, %v413_v32, 0  ;;  %792 = vmatpush.msra.mxu1 %v640_v16 }
 0x19f   : > { %v448_v37 = vand.u32 4294901760, %v420_v34  ;;  %v444_v38 = vand.u32 4294901760, %v443_v33 }
 0x1a1   : > { %v449_v39 = vsub.f32 %v420_v34, %v448_v37  ;;  %445 = vmatmul.f32.vlgmr.msrb.gmra.mxu2 %v444_v38  ;;  %488 = vmatmul.f32.gmra.mxu3 %v448_v37 }
 0x1a2   : > { %706 = vmatpush.msrb.mxu2 %v675_v17 }
 0x1a3   : > { %519 = vmatmul.f32.gmra.mxu0 %v449_v39  ;;  %v450_v1 = vand.u32 4294901760, %v449_v39 }
 0x1a5   : > { %550 = vmatmul.f32.gmra.mxu1 %v450_v1  ;;  %v451_v42 = vsub.f32 %v449_v39, %v450_v1 }
 0x1a7   : > { %v452_v43 = vand.u32 4294901760, %v451_v42 }
 0x1a9   : > { %453 = vmatmul.f32.gmra.mxu2 %v452_v43  ;;  %604 = vmatmul.f32.vlgmr.msra.gmra.mxu3 %v440_v27 }
 0x1aa   : > { %899 = vmatpush.msra.mxu3 %v898_v18 }
 0x1ab   : > { %647 = vmatmul.f32.vlgmr.msrb.gmra.mxu0 %v646_v44 }
 0x1ac   : > { %931 = vmatpush.msrb.mxu0 %v895_v8 }
 0x1ad   : > { %681 = vmatmul.f32.vlgmr.msrb.gmra.mxu1 %v642_v26 }
 0x1ae   : > { %961 = vmatpush.msrb.mxu1 %v859_v4 }
 0x1b1   : > { %577 = vmatmul.f32.vlgmr.msra.gmra.mxu2 %v440_v27  ;;  %608 = vmatmul.f32.gmra.mxu3 %v448_v37 }
 0x1b2   : > { %860 = vmatpush.msra.mxu2 %v859_v4 }
 0x1b3   : > { %655 = vmatmul.f32.gmra.mxu0 %v654_v47  ;;  %v806_v47 = vld [vmem:[%s2228_s1 + $0x38] sm:$0xff] }
 0x1b5   : > { %685 = vmatmul.f32.gmra.mxu1 %v650_v36 }
 0x1b9   : > { %581 = vmatmul.f32.gmra.mxu2 %v448_v37  ;;  %738 = vmatmul.f32.vlgmr.msrb.gmra.mxu3 %v644_v35 }
 0x1bb   : > { %768 = vmatmul.f32.vlgmr.msra.gmra.mxu0 %v642_v26 }
 0x1bd   : > { %794 = vmatmul.f32.vlgmr.msra.gmra.mxu1 %v642_v26 }
 0x1c1   : > { %709 = vmatmul.f32.vlgmr.msrb.gmra.mxu2 %v643_v29  ;;  %744 = vmatmul.f32.gmra.mxu3 %v652_v45 }
 0x1c3   : > { %772 = vmatmul.f32.gmra.mxu0 %v650_v36 }
 0x1c5   : > { %798 = vmatmul.f32.gmra.mxu1 %v650_v36 }
 0x1c9   : > { %714 = vmatmul.f32.gmra.mxu2 %v651_v40 }
 0x218   : > { %v515_v49 = vpop.f32.mrf.mxu0 }
 0x21a   : > { %v545_v50 = vpop.f32.mrf.mxu1 }
 0x21c   : > { %v485_v48 = vpop.f32.mrf.mxu3 }
 0x220   : > { %v520_v53 = vpop.f32.mrf.mxu0 }
 0x222   : > { %v551_v54 = vpop.f32.mrf.mxu1 }
 0x224   : > { %v446_v51 = vpop.f32.mrf.mxu2  ;;  %v489_v52 = vpop.f32.mrf.mxu3 }
 0x225   : > { %v447_v61 = vadd.f32 %v2005_v58, %v446_v51 }
 0x227   : > { %v486_v62 = vadd.f32 %v485_v48, %v447_v61  ;;  %v861_v48 = vand.u32 4294901760, %v806_v47 }
 0x228   : > { %v648_v57 = vpop.f32.mrf.mxu0 }
 0x229   : > { %v516_v10 = vadd.f32 %v515_v49, %v486_v62  ;;  %v649_v12 = vadd.f32 %v2006_v5, %v648_v57  ;;  %v901_v49 = vsub.f32 %v806_v47, %v861_v48  ;;  %862 = vmatpush.msra.mxu2 %v861_v48  ;;  %963 = vmatpush.msrb.mxu1 %v861_v48 }
 0x22a   : > { %v682_v59 = vpop.f32.mrf.mxu1 }
 0x22b   : > { %v546_v16 = vadd.f32 %v545_v50, %v516_v10  ;;  %v683_v20 = vadd.f32 %v682_v59, %v649_v12  ;;  %994 = vmatpush.msrb.mxu2 %v896_v11  ;;  %v902_v50 = vand.u32 4294901760, %v901_v49  ;;  %934 = vmatpush.msrb.mxu0 %v901_v49 }
 0x22c   : > { %v454_v55 = vpop.f32.mrf.mxu2  ;;  %v605_v56 = vpop.f32.mrf.mxu3 }
 0x22d   : > { %v455_v9 = vadd.f32 %v2005_v58, %v454_v55  ;;  %v903_v51 = vsub.f32 %v901_v49, %v902_v50  ;;  %998 = vmatpush.msrb.mxu2 %v902_v50  ;;  %v809_v50 = vld [vmem:[%s2228_s1 + $0x50] sm:$0xff] }
 0x22f   : > { %v490_v15 = vadd.f32 %v489_v52, %v455_v9  ;;  %v904_v52 = vand.u32 4294901760, %v903_v51  ;;  %v1079_v51 = vand.u32 4294901760, %v809_v50 }
 0x230   : > { %v656_v3 = vpop.f32.mrf.mxu0 }
 0x231   : > { %v521_v23 = vadd.f32 %v520_v53, %v490_v15  ;;  %v657_v27 = vadd.f32 %v2006_v5, %v656_v3  ;;  %905 = vmatpush.msra.mxu3 %v904_v52  ;;  %v810_v15 = vld [vmem:[%s2228_s1 + $0x58] sm:$0xff]  ;;  %v1119_v52 = vsub.f32 %v809_v50, %v1079_v51 }
 0x232   : > { %v686_v7 = vpop.f32.mrf.mxu1 }
 0x233   : > { %v552_v29 = vadd.f32 %v551_v54, %v521_v23  ;;  %v687_v32 = vadd.f32 %v686_v7, %v657_v27  ;;  %1023 = vmatpush.msrb.mxu3 %v859_v4 }
 0x234   : > { %v578_v60 = vpop.f32.mrf.mxu2  ;;  %v609_v2 = vpop.f32.mrf.mxu3 }
 0x235   : > { %v579_v19 = vadd.f32 %v578_v60, %v546_v16  ;;  %1025 = vmatpush.msrb.mxu3 %v861_v48 }
 0x237   : > { %v606_v26 = vadd.f32 %v605_v56, %v579_v19 }
 0x238   : > { %v769_v22 = vpop.f32.mrf.mxu0 }
 0x239   : > { %v612_v0 = vmax.f32 %v606_v26, 0.0 }
 0x23a   : > { %v795_v25 = vpop.f32.mrf.mxu1 }
 0x23c   : > { %v582_v6 = vpop.f32.mrf.mxu2  ;;  %v739_v17 = vpop.f32.mrf.mxu3 }
 0x23d   : > { %v583_v31 = vadd.f32 %v582_v6, %v552_v29 }
 0x23f   : > { %v610_v39 = vadd.f32 %v609_v2, %v583_v31 }
 0x240   : > { %v773_v38 = vpop.f32.mrf.mxu0 }
 0x241   : > { %v613_v43 = vmax.f32 %v610_v39, 0.0 }
 0x242   : > { %v799_v41 = vpop.f32.mrf.mxu1 }
 0x244   : > { %v710_v21 = vpop.f32.mrf.mxu2  ;;  %v745_v35 = vpop.f32.mrf.mxu3 }
 0x245   : > { %v711_v24 = vadd.f32 %v710_v21, %v683_v20 }
 0x247   : > { %v740_v28 = vadd.f32 %v739_v17, %v711_v24  ;;  %v1077_v17 = vand.u32 4294901760, %v810_v15 }
 0x249   : > { %v770_v30 = vadd.f32 %v769_v22, %v740_v28  ;;  %1078 = vmatpush.msra.mxu0 %v1077_v17  ;;  %v1113_v18 = vsub.f32 %v810_v15, %v1077_v17 }
 0x24b   : > { %v796_v33 = vadd.f32 %v795_v25, %v770_v30  ;;  %v1114_v20 = vand.u32 4294901760, %v1113_v18  ;;  %1080 = vmatpush.msra.mxu0 %v1079_v51 }
 0x24c   : > { %v715_v34 = vpop.f32.mrf.mxu2 }
 0x24d   : > { %v802_v36 = vadd.f32 %v796_v33, %v612_v0  ;;  %v716_v37 = vadd.f32 %v715_v34, %v687_v32  ;;  %v1115_v22 = vsub.f32 %v1113_v18, %v1114_v20 }
 0x24f   : > { %v2112_v40 = vmax.f32 %v802_v36, 0.0  ;;  %v746_v1 = vadd.f32 %v745_v35, %v716_v37  ;;  %v1116_v26 = vand.u32 4294901760, %v1115_v22 }
 0x251   : > { %v774_v42 = vadd.f32 %v773_v38, %v746_v1  ;;  %830 = vrot.lane.b32.xlu2 %v2112_v40, %s2021_s23  ;;  %v817_v54 = vrot.slane %v2112_v40, 6  ;;  %1117 = vmatpush.msra.mxu1 %v1116_v26 }
 0x253   : > { %v800_v44 = vadd.f32 %v799_v41, %v774_v42 }
 0x255   : > { %v803_v45 = vadd.f32 %v800_v44, %v613_v43 }
 0x257   : > { %v2116_v46 = vmax.f32 %v803_v45, 0.0 }
 0x259   : > { %832 = vrot.lane.b32.xlu2 %v2116_v46, %s2021_s23  ;;  %v813_v53 = vrot.slane %v2116_v46, 6 }
 0x25b   : > { %v821_v55 = vsel %vm816_vm6, %v813_v53, %v817_v54  ;;  %v818_v2 = vsel %vm816_vm6, %v817_v54, %v813_v53  ;;  %v1120_v53 = vand.u32 4294901760, %v1119_v52 }
 0x25c   : > { %v828_v57 = vsel %vm822_vm7, %v821_v55, 0.0 }
 0x25d   : > { %v1121_v54 = vsub.f32 %v1119_v52, %v1120_v53 }
 0x25f   : > { %v1122_v55 = vand.u32 4294901760, %v1121_v54 }
 0x261   : > { %1123 = vmatpush.msra.mxu1 %v1122_v55 }
 0x2ab   : > { %v831_v56 = vpop.permute.xlu2 %830 }
 0x2ac   : > { %v836_v58 = vsel %vm209_vm3, %v828_v57, %v831_v56 }
 0x2ad   : > { %v840_v59 = vsel %vm415_vm5, %v836_v58, 0 }
 0x2ae   : > { %v863_v60 = vand.u32 4294901760, %v840_v59 }
 0x2b0   : > { %v864_v61 = vsub.f32 %v840_v59, %v863_v60  ;;  %907 = vmatmul.f32.vlgmr.msra.gmra.mxu3 %v863_v60 }
 0x2b1   : > { %1179 = vmatpush.msra.mxu3 %v1077_v17 }
 0x2b2   : > { %937 = vmatmul.f32.vlgmr.msrb.gmra.mxu0 %v864_v61  ;;  %v865_v62 = vand.u32 4294901760, %v864_v61 }
 0x2b3   : > { %v833_v63 = vpop.permute.xlu2 %832  ;;  %1181 = vmatpush.msra.mxu3 %v1079_v51  ;;  %1212 = vmatpush.msrb.mxu0 %v1114_v20 }
 0x2b4   : > { %v837_v3 = vsel %vm209_vm3, %v818_v2, %v833_v63  ;;  %967 = vmatmul.f32.vlgmr.msrb.gmra.mxu1 %v865_v62  ;;  %v866_v4 = vsub.f32 %v864_v61, %v865_v62 }
 0x2b5   : > { %v843_v5 = vsel %vm415_vm5, %v837_v3, 0  ;;  %1216 = vmatpush.msrb.mxu0 %v1120_v53  ;;  %1241 = vmatpush.msrb.mxu1 %v1077_v17 }
 0x2b6   : > { %v871_v6 = vand.u32 4294901760, %v843_v5  ;;  %v867_v7 = vand.u32 4294901760, %v866_v4 }
 0x2b7   : > { %1243 = vmatpush.msrb.mxu1 %v1079_v51 }
 0x2b8   : > { %v872_v8 = vsub.f32 %v843_v5, %v871_v6  ;;  %868 = vmatmul.f32.vlgmr.msra.gmra.mxu2 %v867_v7  ;;  %911 = vmatmul.f32.gmra.mxu3 %v871_v6 }
 0x2b9   : > { %1149 = vmatpush.msra.mxu2 %v1113_v18 }
 0x2ba   : > { %942 = vmatmul.f32.gmra.mxu0 %v872_v8  ;;  %v873_v9 = vand.u32 4294901760, %v872_v8 }
 0x2bb   : > { %1152 = vmatpush.msra.mxu2 %v1119_v52 }
 0x2bc   : > { %973 = vmatmul.f32.gmra.mxu1 %v873_v9  ;;  %v874_v10 = vsub.f32 %v872_v8, %v873_v9 }
 0x2be   : > { %v875_v11 = vand.u32 4294901760, %v874_v10 }
 0x2c0   : > { %876 = vmatmul.f32.gmra.mxu2 %v875_v11  ;;  %1027 = vmatmul.f32.vlgmr.msrb.gmra.mxu3 %v863_v60 }
 0x2c8   : > { %1000 = vmatmul.f32.vlgmr.msrb.gmra.mxu2 %v863_v60  ;;  %1031 = vmatmul.f32.gmra.mxu3 %v871_v6 }
 0x2d0   : > { %1004 = vmatmul.f32.gmra.mxu2 %v871_v6 }
 0x32f   : > { %v938_v24 = vpop.f32.mrf.mxu0 }
 0x331   : > { %v968_v29 = vpop.f32.mrf.mxu1 }
 0x333   : > { %v908_v12 = vpop.f32.mrf.mxu3 }
 0x337   : > { %v943_v34 = vpop.f32.mrf.mxu0 }
 0x339   : > { %v974_v38 = vpop.f32.mrf.mxu1 }
 0x33b   : > { %v869_v16 = vpop.f32.mrf.mxu2  ;;  %v912_v21 = vpop.f32.mrf.mxu3 }
 0x33c   : > { %v870_v19 = vadd.f32 %v2007_v13, %v869_v16 }
 0x33e   : > { %v909_v23 = vadd.f32 %v908_v12, %v870_v19  ;;  %v2008_v12 = vld [vmem:[%s2228_s1 + $0x60] ss:$0 sm:$0xff] }
 0x340   : > { %v939_v28 = vadd.f32 %v938_v24, %v909_v23 }
 0x342   : > { %v969_v0 = vadd.f32 %v968_v29, %v939_v28 }
 0x343   : > { %v877_v25 = vpop.f32.mrf.mxu2  ;;  %v1028_v31 = vpop.f32.mrf.mxu3 }
 0x344   : > { %v878_v27 = vadd.f32 %v2007_v13, %v877_v25 }
 0x346   : > { %v913_v30 = vadd.f32 %v912_v21, %v878_v27 }
 0x348   : > { %v944_v36 = vadd.f32 %v943_v34, %v913_v30 }
 0x34a   : > { %v975_v39 = vadd.f32 %v974_v38, %v944_v36 }
 0x34b   : > { %v1001_v32 = vpop.f32.mrf.mxu2  ;;  %v1032_v42 = vpop.f32.mrf.mxu3 }
 0x34c   : > { %v1002_v33 = vadd.f32 %v1001_v32, %v969_v0 }
 0x34e   : > { %v1029_v35 = vadd.f32 %v1028_v31, %v1002_v33 }
 0x350   : > { %v1035_v37 = vmax.f32 %v1029_v35, 0.0 }
 0x352   : > { %1048 = vrot.lane.b32.xlu0 %v1035_v37, %s2021_s23  ;;  %v1041_v45 = vrot.slane %v1035_v37, 6 }
 0x353   : > { %v1005_v1 = vpop.f32.mrf.mxu2 }
 0x354   : > { %v1006_v41 = vadd.f32 %v1005_v1, %v975_v39 }
 0x356   : > { %v1033_v43 = vadd.f32 %v1032_v42, %v1006_v41 }
 0x358   : > { %v1036_v44 = vmax.f32 %v1033_v43, 0.0 }
 0x35a   : > { %v1038_v47 = vrot.slane %v1036_v44, 6  ;;  %1050 = vrot.lane.b32.xlu1 %v1036_v44, %s2021_s23 }
 0x35c   : > { %v1045_v48 = vsel %vm816_vm6, %v1038_v47, %v1041_v45  ;;  %v1042_v49 = vsel %vm816_vm6, %v1041_v45, %v1038_v47  ;;  %v1260_v45 = vld [vmem:[%s2228_s1 + $0x70] sm:$0xff] }
 0x35d   : > { %v1046_v57 = vsel %vm822_vm7, %v1045_v48, 0.0  ;;  %v1313_v47 = vand.u32 4294901760, %v1260_v45 }
 0x35f   : > { %v1349_v48 = vsub.f32 %v1260_v45, %v1313_v47  ;;  %1314 = vmatpush.msrb.mxu2 %v1313_v47 }
 0x361   : > { %v1350_v50 = vand.u32 4294901760, %v1349_v48 }
 0x363   : > { %v1351_v52 = vsub.f32 %v1349_v48, %v1350_v50 }
 0x365   : > { %v1352_v54 = vand.u32 4294901760, %v1351_v52 }
 0x367   : > { %1353 = vmatpush.msrb.mxu3 %v1352_v54  ;;  %v1262_v54 = vld [vmem:[%s2228_s1 + $0x80] sm:$0xff] }
 0x3c4   : > { %v1049_v56 = vpop.permute.xlu0 %1048 }
 0x3c5   : > { %v1054_v58 = vsel %vm209_vm3, %v1046_v57, %v1049_v56 }
 0x3c6   : > { %v1058_v59 = vsel %vm415_vm5, %v1054_v58, 0 }
 0x3c7   : > { %v1081_v60 = vand.u32 4294901760, %v1058_v59 }
 0x3c9   : > { %v1082_v61 = vsub.f32 %v1058_v59, %v1081_v60  ;;  %1125 = vmatmul.f32.vlgmr.msra.gmra.mxu1 %v1081_v60 }
 0x3ca   : > { %1415 = vmatpush.msra.mxu1 %v1313_v47 }
 0x3cb   : > { %1155 = vmatmul.f32.vlgmr.msra.gmra.mxu2 %v1082_v61  ;;  %v1083_v62 = vand.u32 4294901760, %v1082_v61 }
 0x3cc   : > { %v1051_v63 = vpop.permute.xlu1 %1050 }
 0x3cd   : > { %v1055_v2 = vsel %vm209_vm3, %v1042_v49, %v1051_v63  ;;  %1185 = vmatmul.f32.vlgmr.msra.gmra.mxu3 %v1083_v62  ;;  %v1084_v3 = vsub.f32 %v1082_v61, %v1083_v62 }
 0x3ce   : > { %v1061_v4 = vsel %vm415_vm5, %v1055_v2, 0 }
 0x3cf   : > { %v1089_v5 = vand.u32 4294901760, %v1061_v4  ;;  %v1085_v6 = vand.u32 4294901760, %v1084_v3 }
 0x3d1   : > { %v1090_v7 = vsub.f32 %v1061_v4, %v1089_v5  ;;  %1086 = vmatmul.f32.vlgmr.msra.gmra.mxu0 %v1085_v6  ;;  %1129 = vmatmul.f32.gmra.mxu1 %v1089_v5 }
 0x3d2   : > { %1385 = vmatpush.msra.mxu0 %v1349_v48 }
 0x3d3   : > { %1160 = vmatmul.f32.gmra.mxu2 %v1090_v7  ;;  %v1091_v8 = vand.u32 4294901760, %v1090_v7 }
 0x3d5   : > { %1191 = vmatmul.f32.gmra.mxu3 %v1091_v8  ;;  %v1092_v9 = vsub.f32 %v1090_v7, %v1091_v8 }
 0x3d7   : > { %v1093_v10 = vand.u32 4294901760, %v1092_v9 }
 0x3d9   : > { %1094 = vmatmul.f32.gmra.mxu0 %v1093_v10  ;;  %1245 = vmatmul.f32.vlgmr.msrb.gmra.mxu1 %v1081_v60 }
 0x3e1   : > { %1218 = vmatmul.f32.vlgmr.msrb.gmra.mxu0 %v1081_v60  ;;  %1249 = vmatmul.f32.gmra.mxu1 %v1089_v5 }
 0x3e9   : > { %1222 = vmatmul.f32.gmra.mxu0 %v1089_v5 }
 0x446   : > { %v1126_v11 = vpop.f32.mrf.mxu1 }
 0x44e   : > { %v1087_v13 = vpop.f32.mrf.mxu0  ;;  %v1130_v16 = vpop.f32.mrf.mxu1 }
 0x44f   : > { %v1088_v15 = vadd.f32 %v2008_v12, %v1087_v13  ;;  %v1156_v18 = vpop.f32.mrf.mxu2  ;;  %v2009_v13 = vld [vmem:[%s2228_s1 + $0x78] ss:$0 sm:$0xff] }
 0x450   : > { %v1186_v22 = vpop.f32.mrf.mxu3 }
 0x451   : > { %v1127_v17 = vadd.f32 %v1126_v11, %v1088_v15 }
 0x453   : > { %v1157_v20 = vadd.f32 %v1156_v18, %v1127_v17 }
 0x455   : > { %v1187_v23 = vadd.f32 %v1186_v22, %v1157_v20 }
 0x456   : > { %v1095_v19 = vpop.f32.mrf.mxu0  ;;  %v1246_v25 = vpop.f32.mrf.mxu1 }
 0x457   : > { %v1096_v21 = vadd.f32 %v2008_v12, %v1095_v19  ;;  %v1161_v28 = vpop.f32.mrf.mxu2 }
 0x458   : > { %v1192_v31 = vpop.f32.mrf.mxu3 }
 0x459   : > { %v1131_v24 = vadd.f32 %v1130_v16, %v1096_v21 }
 0x45b   : > { %v1162_v29 = vadd.f32 %v1161_v28, %v1131_v24 }
 0x45d   : > { %v1193_v32 = vadd.f32 %v1192_v31, %v1162_v29 }
 0x45e   : > { %v1219_v26 = vpop.f32.mrf.mxu0  ;;  %v1250_v37 = vpop.f32.mrf.mxu1 }
 0x45f   : > { %v1220_v27 = vadd.f32 %v1219_v26, %v1187_v23 }
 0x461   : > { %v1247_v30 = vadd.f32 %v1246_v25, %v1220_v27 }
 0x463   : > { %v1253_v0 = vmax.f32 %v1247_v30, 0.0 }
 0x465   : > { %v1255_v33 = vadd.f32 %v1253_v0, %v2112_v40 }
 0x466   : > { %v1223_v34 = vpop.f32.mrf.mxu0 }
 0x467   : > { %v1224_v35 = vadd.f32 %v1223_v34, %v1193_v32  ;;  %v2157_v36 = vmax.f32 %v1255_v33, 0.0 }
 0x469   : > { %v1251_v38 = vadd.f32 %v1250_v37, %v1224_v35  ;;  %1284 = vrot.lane.b32.xlu2 %v2157_v36, %s2021_s23  ;;  %v1271_v42 = vrot.slane %v2157_v36, 4 }
 0x46b   : > { %v1254_v39 = vmax.f32 %v1251_v38, 0.0 }
 0x46d   : > { %v1256_v1 = vadd.f32 %v1254_v39, %v2116_v46  ;;  %v1259_v46 = vld [vmem:[%s2228_s1 + $0x68] sm:$0xff] }
 0x46e   : > { %v1315_v49 = vand.u32 4294901760, %v1259_v46 }
 0x46f   : > { %v2162_v41 = vmax.f32 %v1256_v1, 0.0 }
 0x470   : > { %v1355_v51 = vsub.f32 %v1259_v46, %v1315_v49  ;;  %1417 = vmatpush.msra.mxu1 %v1315_v49  ;;  %1316 = vmatpush.msrb.mxu2 %v1315_v49 }
 0x471   : > { %1286 = vrot.lane.b32.xlu0 %v2162_v41, %s2021_s23  ;;  %v1268_v40 = vrot.slane %v2162_v41, 4 }
 0x472   : > { %v1356_v53 = vand.u32 4294901760, %v1355_v51  ;;  %1388 = vmatpush.msra.mxu0 %v1355_v51  ;;  %1448 = vmatpush.msra.mxu2 %v1350_v50  ;;  %v1263_v50 = vld [vmem:[%s2228_s1 + $0x88] sm:$0xff] }
 0x473   : > { %v1275_v43 = vsel %vm621_vm4, %v1268_v40, %v1271_v42  ;;  %v1272_v44 = vsel %vm621_vm4, %v1271_v42, %v1268_v40  ;;  %v1534_v52 = vand.u32 4294901760, %v1263_v50 }
 0x474   : > { %v1357_v55 = vsub.f32 %v1355_v51, %v1356_v53  ;;  %1452 = vmatpush.msra.mxu2 %v1356_v53  ;;  %v1282_v58 = vsel %vm1276_vm8, %v1275_v43, 0.0 }
 0x476   : > { %v1358_v56 = vand.u32 4294901760, %v1357_v55 }
 0x478   : > { %1359 = vmatpush.msrb.mxu3 %v1358_v56  ;;  %v1580_v56 = vsub.f32 %v1263_v50, %v1534_v52 }
 0x47a   : > { %1477 = vmatpush.msra.mxu3 %v1313_v47  ;;  %v1264_v47 = vld [vmem:[%s2228_s1 + $0x90] sm:$0xff] }
 0x47b   : > { %v1532_v46 = vand.u32 4294901760, %v1264_v47 }
 0x47c   : > { %1479 = vmatpush.msra.mxu3 %v1315_v49 }
 0x47d   : > { %v1574_v49 = vsub.f32 %v1264_v47, %v1532_v46 }
 0x47f   : > { %v1575_v53 = vand.u32 4294901760, %v1574_v49 }
 0x4c3   : > { %v1285_v57 = vpop.permute.xlu2 %1284 }
 0x4c4   : > { %v1290_v59 = vsel %vm209_vm3, %v1282_v58, %v1285_v57  ;;  %v1536_v57 = vand.u32 4294901760, %v1262_v54  ;;  %v1576_v58 = vsub.f32 %v1574_v49, %v1575_v53 }
 0x4c5   : > { %v1294_v60 = vsel %vm415_vm5, %v1290_v59, 0 }
 0x4c6   : > { %v1317_v61 = vand.u32 4294901760, %v1294_v60 }
 0x4c8   : > { %v1318_v62 = vsub.f32 %v1294_v60, %v1317_v61  ;;  %1361 = vmatmul.f32.vlgmr.msrb.gmra.mxu3 %v1317_v61  ;;  %v1581_v60 = vand.u32 4294901760, %v1580_v56 }
 0x4ca   : > { %1391 = vmatmul.f32.vlgmr.msra.gmra.mxu0 %v1318_v62  ;;  %v1319_v63 = vand.u32 4294901760, %v1318_v62 }
 0x4cc   : > { %1421 = vmatmul.f32.vlgmr.msra.gmra.mxu1 %v1319_v63  ;;  %v1320_v2 = vsub.f32 %v1318_v62, %v1319_v63  ;;  %v1577_v62 = vand.u32 4294901760, %v1576_v58  ;;  %v1582_v63 = vsub.f32 %v1580_v56, %v1581_v60 }
 0x4ce   : > { %v1321_v3 = vand.u32 4294901760, %v1320_v2 }
 0x4d0   : > { %1322 = vmatmul.f32.vlgmr.msrb.gmra.mxu2 %v1321_v3  ;;  %v1583_v3 = vand.u32 4294901760, %v1582_v63 }
 0x4e3   : > { %v1287_v4 = vpop.permute.xlu0 %1286 }
 0x4e4   : > { %v1291_v5 = vsel %vm209_vm3, %v1272_v44, %v1287_v4  ;;  %v1265_v44 = vld [vmem:[%s2228_s1 + $0x98] sm:$0xff] }
 0x4e5   : > { %v1297_v6 = vsel %vm415_vm5, %v1291_v5, 0  ;;  %v1530_v45 = vand.u32 4294901760, %v1265_v44 }
 0x4e6   : > { %v1325_v7 = vand.u32 4294901760, %v1297_v6 }
 0x4e7   : > { %v1568_v48 = vsub.f32 %v1265_v44, %v1530_v45  ;;  %1531 = vmatpush.msrb.mxu0 %v1530_v45  ;;  %1648 = vmatpush.msrb.mxu3 %v1530_v45 }
 0x4e8   : > { %v1326_v8 = vsub.f32 %v1297_v6, %v1325_v7  ;;  %1365 = vmatmul.f32.gmra.mxu3 %v1325_v7  ;;  %v1736_v6 = vld [vmem:[%s2228_s1 + $0xa8] sm:$0xff] }
 0x4e9   : > { %1614 = vmatpush.msrb.mxu2 %v1568_v48  ;;  %v1569_v51 = vand.u32 4294901760, %v1568_v48  ;;  %1533 = vmatpush.msrb.mxu0 %v1532_v46 }
 0x4ea   : > { %1396 = vmatmul.f32.gmra.mxu0 %v1326_v8  ;;  %v1327_v9 = vand.u32 4294901760, %v1326_v8  ;;  %1650 = vmatpush.msrb.mxu3 %v1532_v46 }
 0x4eb   : > { %v1570_v55 = vsub.f32 %v1568_v48, %v1569_v51  ;;  %1617 = vmatpush.msrb.mxu2 %v1574_v49  ;;  %1535 = vmatpush.msrb.mxu0 %v1534_v52  ;;  %v2010_v48 = vld [vmem:[%s2228_s1 + $0xa0] ss:$0 sm:$0xff] }
 0x4ec   : > { %1427 = vmatmul.f32.gmra.mxu1 %v1327_v9  ;;  %v1328_v10 = vsub.f32 %v1326_v8, %v1327_v9  ;;  %1652 = vmatpush.msrb.mxu3 %v1534_v52 }
 0x4ed   : > { %v1571_v59 = vand.u32 4294901760, %v1570_v55  ;;  %1620 = vmatpush.msrb.mxu2 %v1580_v56  ;;  %1537 = vmatpush.msrb.mxu0 %v1536_v57  ;;  %v2011_v55 = vld [vmem:[%s2228_s1 + $0xb0] ss:$0 sm:$0xff] }
 0x4ee   : > { %v1329_v11 = vand.u32 4294901760, %v1328_v10  ;;  %1654 = vmatpush.msrb.mxu3 %v1536_v57 }
 0x4ef   : > { %1683 = vmatpush.msra.mxu0 %v1569_v51  ;;  %1572 = vmatpush.msrb.mxu1 %v1571_v59 }
 0x4f0   : > { %1330 = vmatmul.f32.gmra.mxu2 %v1329_v11  ;;  %1481 = vmatmul.f32.vlgmr.msra.gmra.mxu3 %v1317_v61 }
 0x4f1   : > { %1687 = vmatpush.msra.mxu0 %v1575_v53  ;;  %1578 = vmatpush.msrb.mxu1 %v1577_v62 }
 0x4f3   : > { %1691 = vmatpush.msra.mxu0 %v1581_v60  ;;  %1584 = vmatpush.msrb.mxu1 %v1583_v3 }
 0x4f8   : > { %1454 = vmatmul.f32.vlgmr.msra.gmra.mxu2 %v1317_v61  ;;  %1485 = vmatmul.f32.gmra.mxu3 %v1325_v7  ;;  %v1586_v61 = vsub.f32 %v1262_v54, %v1536_v57 }
 0x4fa   : > { %v1587_v2 = vand.u32 4294901760, %v1586_v61  ;;  %1623 = vmatpush.msrb.mxu2 %v1586_v61 }
 0x4fc   : > { %v1588_v4 = vsub.f32 %v1586_v61, %v1587_v2  ;;  %1695 = vmatpush.msra.mxu0 %v1587_v2 }
 0x4fe   : > { %v1589_v5 = vand.u32 4294901760, %v1588_v4 }
 0x500   : > { %1458 = vmatmul.f32.gmra.mxu2 %v1325_v7  ;;  %1590 = vmatpush.msrb.mxu1 %v1589_v5  ;;  %v1758_v7 = vand.u32 4294901760, %v1736_v6 }
 0x502   : > { %1718 = vmatpush.msra.mxu1 %v1530_v45  ;;  %1759 = vmatpush.msra.mxu2 %v1758_v7  ;;  %v1793_v8 = vsub.f32 %v1736_v6, %v1758_v7 }
 0x504   : > { %1720 = vmatpush.msra.mxu1 %v1532_v46  ;;  %v1794_v9 = vand.u32 4294901760, %v1793_v8 }
 0x506   : > { %1722 = vmatpush.msra.mxu1 %v1534_v52  ;;  %v1795_v10 = vsub.f32 %v1793_v8, %v1794_v9 }
 0x508   : > { %1724 = vmatpush.msra.mxu1 %v1536_v57  ;;  %v1796_v11 = vand.u32 4294901760, %v1795_v10 }
 0x50a   : > { %1797 = vmatpush.msra.mxu3 %v1796_v11 }
 0x547   : > { %v1392_v20 = vpop.f32.mrf.mxu0 }
 0x549   : > { %v1422_v23 = vpop.f32.mrf.mxu1 }
 0x54b   : > { %v1362_v12 = vpop.f32.mrf.mxu3 }
 0x553   : > { %v1323_v15 = vpop.f32.mrf.mxu2 }
 0x554   : > { %v1324_v16 = vadd.f32 %v2009_v13, %v1323_v15 }
 0x556   : > { %v1363_v18 = vadd.f32 %v1362_v12, %v1324_v16 }
 0x558   : > { %v1393_v22 = vadd.f32 %v1392_v20, %v1363_v18 }
 0x55a   : > { %v1423_v25 = vadd.f32 %v1422_v23, %v1393_v22 }
 0x567   : > { %v1397_v29 = vpop.f32.mrf.mxu0 }
 0x569   : > { %v1428_v32 = vpop.f32.mrf.mxu1 }
 0x56b   : > { %v1366_v17 = vpop.f32.mrf.mxu3 }
 0x573   : > { %v1331_v19 = vpop.f32.mrf.mxu2  ;;  %v1482_v26 = vpop.f32.mrf.mxu3 }
 0x574   : > { %v1332_v21 = vadd.f32 %v2009_v13, %v1331_v19  ;;  %v1739_v19 = vsel %vm209_vm3, %v2157_v36, 0 }
 0x575   : > { %v1760_v23 = vand.u32 4294901760, %v1739_v19 }
 0x576   : > { %v1367_v24 = vadd.f32 %v1366_v17, %v1332_v21 }
 0x578   : > { %v1398_v0 = vadd.f32 %v1397_v29, %v1367_v24 }
 0x57a   : > { %v1429_v33 = vadd.f32 %v1428_v32, %v1398_v0 }
 0x57b   : > { %v1455_v27 = vpop.f32.mrf.mxu2  ;;  %v1486_v37 = vpop.f32.mrf.mxu3 }
 0x57c   : > { %v1456_v28 = vadd.f32 %v1455_v27, %v1423_v25  ;;  %v1761_v27 = vsub.f32 %v1739_v19, %v1760_v23 }
 0x57e   : > { %v1483_v30 = vadd.f32 %v1482_v26, %v1456_v28  ;;  %v1741_v28 = vsel %vm209_vm3, %v2162_v41, 0 }
 0x57f   : > { %v1768_v0 = vand.u32 4294901760, %v1741_v28 }
 0x580   : > { %v1489_v31 = vmax.f32 %v1483_v30, 0.0  ;;  %v1762_v30 = vand.u32 4294901760, %v1761_v27 }
 0x582   : > { %1502 = vrot.lane.b32.xlu1 %v1489_v31, %s2022_s25  ;;  %v1495_v1 = vrot.slane %v1489_v31, 4  ;;  %v1763_v32 = vsub.f32 %v1761_v27, %v1762_v30 }
 0x583   : > { %v1459_v34 = vpop.f32.mrf.mxu2 }
 0x584   : > { %v1460_v35 = vadd.f32 %v1459_v34, %v1429_v33  ;;  %v1769_v33 = vsub.f32 %v1741_v28, %v1768_v0 }
 0x586   : > { %v1487_v38 = vadd.f32 %v1486_v37, %v1460_v35  ;;  %v1764_v35 = vand.u32 4294901760, %v1763_v32  ;;  %v1770_v37 = vand.u32 4294901760, %v1769_v33 }
 0x588   : > { %v1490_v39 = vmax.f32 %v1487_v38, 0.0  ;;  %v1771_v41 = vsub.f32 %v1769_v33, %v1770_v37 }
 0x58a   : > { %v1492_v42 = vrot.slane %v1490_v39, 4  ;;  %1504 = vrot.lane.b32.xlu2 %v1490_v39, %s2022_s25  ;;  %v1772_v38 = vand.u32 4294901760, %v1771_v41 }
 0x58c   : > { %v1496_v40 = vsel %vm621_vm4, %v1495_v1, %v1492_v42  ;;  %v1499_v43 = vsel %vm621_vm4, %v1492_v42, %v1495_v1 }
 0x58d   : > { %v1500_v17 = vsel %vm1276_vm8, %v1499_v43, 0.0 }
 0x5e4   : > { %v1505_v12 = vpop.permute.xlu2 %1504 }
 0x5e5   : > { %v1509_v13 = vsel %vm415_vm5, %v1496_v40, %v1505_v12 }
 0x5e6   : > { %v1516_v15 = vsel %vm1511_vm9, %v1509_v13, 0 }
 0x5e7   : > { %v1546_v21 = vand.u32 4294901760, %v1516_v15 }
 0x5e9   : > { %v1547_v25 = vsub.f32 %v1516_v15, %v1546_v21 }
 0x5eb   : > { %v1548_v36 = vand.u32 4294901760, %v1547_v25 }
 0x5ed   : > { %v1549_v31 = vsub.f32 %v1547_v25, %v1548_v36 }
 0x5ef   : > { %v1550_v34 = vand.u32 4294901760, %v1549_v31 }
 0x5f4   : > { %v1503_v16 = vpop.permute.xlu1 %1502 }
 0x5f5   : > { %v1508_v18 = vsel %vm415_vm5, %v1500_v17, %v1503_v16 }
 0x5f6   : > { %v1513_v20 = vsel %vm1511_vm9, %v1508_v18, 0 }
 0x5f7   : > { %v1538_v22 = vand.u32 4294901760, %v1513_v20 }
 0x5f9   : > { %v1539_v24 = vsub.f32 %v1513_v20, %v1538_v22  ;;  %1592 = vmatmul.f32.vlgmr.msrb.gmra.mxu1 %v1538_v22 }
 0x5fa   : > { %1852 = vmatpush.msrb.mxu1 %v1758_v7 }
 0x5fb   : > { %1626 = vmatmul.f32.vlgmr.msrb.gmra.mxu2 %v1539_v24  ;;  %v1540_v26 = vand.u32 4294901760, %v1539_v24 }
 0x5fc   : > { %1884 = vmatpush.msrb.mxu2 %v1794_v9 }
 0x5fd   : > { %1658 = vmatmul.f32.vlgmr.msrb.gmra.mxu3 %v1540_v26  ;;  %v1541_v14 = vsub.f32 %v1539_v24, %v1540_v26 }
 0x5fe   : > { %1910 = vmatpush.msrb.mxu3 %v1758_v7 }
 0x5ff   : > { %v1542_v29 = vand.u32 4294901760, %v1541_v14 }
 0x601   : > { %1543 = vmatmul.f32.vlgmr.msrb.gmra.mxu0 %v1542_v29  ;;  %1596 = vmatmul.f32.gmra.mxu1 %v1546_v21 }
 0x602   : > { %1824 = vmatpush.msrb.mxu0 %v1793_v8 }
 0x603   : > { %1631 = vmatmul.f32.gmra.mxu2 %v1547_v25 }
 0x605   : > { %1664 = vmatmul.f32.gmra.mxu3 %v1548_v36 }
 0x609   : > { %1551 = vmatmul.f32.gmra.mxu0 %v1550_v34  ;;  %1726 = vmatmul.f32.vlgmr.msra.gmra.mxu1 %v1538_v22 }
 0x60b   : > { %1765 = vmatmul.f32.vlgmr.msra.gmra.mxu2 %v1764_v35 }
 0x60d   : > { %1799 = vmatmul.f32.vlgmr.msra.gmra.mxu3 %v1760_v23 }
 0x611   : > { %1697 = vmatmul.f32.vlgmr.msra.gmra.mxu0 %v1538_v22  ;;  %1730 = vmatmul.f32.gmra.mxu1 %v1546_v21 }
 0x613   : > { %1773 = vmatmul.f32.gmra.mxu2 %v1772_v38 }
 0x615   : > { %1803 = vmatmul.f32.gmra.mxu3 %v1768_v0 }
 0x619   : > { %1701 = vmatmul.f32.gmra.mxu0 %v1546_v21  ;;  %1856 = vmatmul.f32.vlgmr.msrb.gmra.mxu1 %v1762_v30 }
 0x61b   : > { %1886 = vmatmul.f32.vlgmr.msrb.gmra.mxu2 %v1760_v23 }
 0x61d   : > { %1912 = vmatmul.f32.vlgmr.msrb.gmra.mxu3 %v1760_v23 }
 0x621   : > { %1827 = vmatmul.f32.vlgmr.msrb.gmra.mxu0 %v1761_v27  ;;  %1862 = vmatmul.f32.gmra.mxu1 %v1770_v37 }
 0x623   : > { %1890 = vmatmul.f32.gmra.mxu2 %v1768_v0 }
 0x625   : > { %1916 = vmatmul.f32.gmra.mxu3 %v1768_v0 }
 0x629   : > { %1832 = vmatmul.f32.gmra.mxu0 %v1769_v33 }
 0x676   : > { %v1593_v39 = vpop.f32.mrf.mxu1 }
 0x67e   : > { %v1544_v1 = vpop.f32.mrf.mxu0  ;;  %v1627_v42 = vpop.f32.mrf.mxu2 }
 0x67f   : > { %v1597_v40 = vpop.f32.mrf.mxu1  ;;  %v1545_v50 = vadd.f32 %v2010_v48, %v1544_v1 }
 0x680   : > { %v1659_v43 = vpop.f32.mrf.mxu3 }
 0x681   : > { %v1594_v53 = vadd.f32 %v1593_v39, %v1545_v50 }
 0x683   : > { %v1628_v57 = vadd.f32 %v1627_v42, %v1594_v53 }
 0x685   : > { %v1660_v62 = vadd.f32 %v1659_v43, %v1628_v57 }
 0x686   : > { %v1552_v44 = vpop.f32.mrf.mxu0  ;;  %v1632_v45 = vpop.f32.mrf.mxu2 }
 0x687   : > { %v1727_v46 = vpop.f32.mrf.mxu1  ;;  %v1553_v58 = vadd.f32 %v2010_v48, %v1552_v44 }
 0x688   : > { %v1665_v47 = vpop.f32.mrf.mxu3 }
 0x689   : > { %v1598_v63 = vadd.f32 %v1597_v40, %v1553_v58 }
 0x68b   : > { %v1633_v6 = vadd.f32 %v1632_v45, %v1598_v63 }
 0x68d   : > { %v1666_v13 = vadd.f32 %v1665_v47, %v1633_v6 }
 0x68e   : > { %v1698_v49 = vpop.f32.mrf.mxu0  ;;  %v1766_v51 = vpop.f32.mrf.mxu2 }
 0x68f   : > { %v1731_v54 = vpop.f32.mrf.mxu1  ;;  %v1767_v61 = vadd.f32 %v2011_v55, %v1766_v51  ;;  %v1699_v2 = vadd.f32 %v1698_v49, %v1660_v62 }
 0x690   : > { %v1800_v52 = vpop.f32.mrf.mxu3 }
 0x691   : > { %v1801_v3 = vadd.f32 %v1800_v52, %v1767_v61  ;;  %v1728_v9 = vadd.f32 %v1727_v46, %v1699_v2 }
 0x693   : > { %v1734_v16 = vmax.f32 %v1728_v9, 0.0 }
 0x696   : > { %v1702_v56 = vpop.f32.mrf.mxu0  ;;  %v1774_v59 = vpop.f32.mrf.mxu2 }
 0x697   : > { %v1857_v4 = vpop.f32.mrf.mxu1  ;;  %v1775_v10 = vadd.f32 %v2011_v55, %v1774_v59  ;;  %v1703_v17 = vadd.f32 %v1702_v56, %v1666_v13 }
 0x698   : > { %v1804_v60 = vpop.f32.mrf.mxu3 }
 0x699   : > { %v1805_v18 = vadd.f32 %v1804_v60, %v1775_v10  ;;  %v1732_v24 = vadd.f32 %v1731_v54, %v1703_v17 }
 0x69b   : > { %v1735_v29 = vmax.f32 %v1732_v24, 0.0 }
 0x69e   : > { %v1828_v5 = vpop.f32.mrf.mxu0  ;;  %v1887_v8 = vpop.f32.mrf.mxu2 }
 0x69f   : > { %v1829_v7 = vadd.f32 %v1828_v5, %v1801_v3  ;;  %v1863_v23 = vpop.f32.mrf.mxu1 }
 0x6a0   : > { %v1913_v12 = vpop.f32.mrf.mxu3 }
 0x6a1   : > { %v1858_v11 = vadd.f32 %v1857_v4, %v1829_v7 }
 0x6a3   : > { %v1888_v15 = vadd.f32 %v1887_v8, %v1858_v11 }
 0x6a5   : > { %v1914_v19 = vadd.f32 %v1913_v12, %v1888_v15 }
 0x6a6   : > { %v1833_v20 = vpop.f32.mrf.mxu0  ;;  %v1891_v27 = vpop.f32.mrf.mxu2 }
 0x6a7   : > { %v1920_v21 = vadd.f32 %v1914_v19, %v1734_v16  ;;  %v1834_v22 = vadd.f32 %v1833_v20, %v1805_v18 }
 0x6a8   : > { %v1917_v28 = vpop.f32.mrf.mxu3 }
 0x6a9   : > { %v1922_v25 = vmax.f32 %v1920_v21, 0.0  ;;  %v1864_v26 = vadd.f32 %v1863_v23, %v1834_v22 }
 0x6ab   : > { %1924 = vst.msk [vmem:[%s145_s17] sm:$0xff] %vm415_vm5, %v1922_v25  ;;  %v1892_v14 = vadd.f32 %v1891_v27, %v1864_v26 }
 0x6ad   : > { %v1918_v36 = vadd.f32 %v1917_v28, %v1892_v14 }
 0x6af   : > { %v1921_v30 = vadd.f32 %v1918_v36, %v1735_v29 }
 0x6b1   : > { %v1923_v0 = vmax.f32 %v1921_v30, 0.0 }
 0x6b3   : > { %1925 = vst.msk [vmem:[%s145_s17 + $0x8] sm:$0xff] %vm415_vm5, %v1923_v0 }
 0x6b4 PF: > { %s12_s9 = sadd.s32 1, %s2018_s9  }
 0x6b5   : > { %p9_p4 = scmp.ge.s32.totalorder %s12_s9, 4  }
 0x6b7   :  { %11 = sbr.rel (!%p9_p4) target bundleno = 1 (0x1), region = 58 }

</bundles_post_ra>
